<compile_context>
chip_gen: v6e
topology: v6e:2x2x1
jax: 0.10.0
libtpu: 0.0.40
codegen_flags: <defaults>
</compile_context>

<pallas_src>
import math
from functools import partial

import jax
import jax.numpy as jnp
from jax import lax
from jax.experimental import pallas as pl
from jax.experimental.pallas import tpu as pltpu


def _ghost_kernel(x_ref, w1_ref, wdw_ref, b2_ref, out_ref, *, W):
    """One grid step processes Nb images.

    x_ref   : (Nb, C1+1, HW)  bf16  input with a ones row appended (BN1 bias fold), HW on lanes
    w1_ref  : (c_init, C1+1)  bf16  1x1 conv weight, BN1 scale folded, bias as last column
    wdw_ref : (9, c_init, HW) f32   depthwise taps, BN2 scale + SAME-padding masks folded,
                                    pre-broadcast along HW (no lane splats in the body)
    b2_ref  : (c_init, HW)    f32   BN2 bias, pre-broadcast along HW
    out_ref : (Nb, 2*c_init, HW)    fused concat([x1, x2], channel)
    """
    nb = x_ref.shape[0]
    HW = x_ref.shape[2]
    c_init = w1_ref.shape[0]

    w1 = w1_ref[...]          # resident bf16 weights
    wdw = wdw_ref[...]        # resident f32 pre-masked / pre-broadcast taps
    b2 = b2_ref[...]

    for b in range(nb):       # small static unroll over the images of this grid step
        # ---- primary conv: 1x1 conv + BN1 == one MXU matmul (bias via the ones row) ----
        y = jnp.dot(w1, x_ref[b], preferred_element_type=jnp.float32)   # (c_init, HW) f32
        x1 = y * jnp.clip(y + 3.0, 0.0, 6.0) * (1.0 / 6.0)              # Hardswish (f32 VPU)

        # ---- cheap operation: depthwise 3x3, stride 1, SAME padding ----
        # Separable-in-shift; all padding masks are pre-folded into wdw, so this is
        # 4 XLU rolls + 9 vreg multiplies + adds, no selects / broadcasts.
        x_l = pltpu.roll(x1, shift=1, axis=1)             # x1[p-1]  (left neighbour, unmasked)
        x_r = pltpu.roll(x1, shift=HW - 1, axis=1)        # x1[p+1]  (right neighbour, unmasked)

        h_t = wdw[0] * x_l + wdw[1] * x1 + wdw[2] * x_r   # taps of the row above   (oy = -1)
        h_c = wdw[3] * x_l + wdw[4] * x1 + wdw[5] * x_r   # same row                (oy =  0)
        h_b = wdw[6] * x_l + wdw[7] * x1 + wdw[8] * x_r   # row below               (oy = +1)

        x2 = (h_c
              + pltpu.roll(h_t, shift=W, axis=1)          # h_t[p - W]
              + pltpu.roll(h_b, shift=HW - W, axis=1)     # h_b[p + W]
              + b2)                                       # folded BN2 bias, no activation

        # ---- fused concat([x1, x2], channel) ----
        if c_init % 8 == 0:
            # both halves sublane-tile aligned -> one full-block, unmasked store
            out_ref[b] = jnp.concatenate([x1, x2], axis=0).astype(out_ref.dtype)
        else:
            # fallback for odd GhostNet widths: two half stores (Mosaic masked sublane stores)
            out_ref[b, :c_init, :] = x1.astype(out_ref.dtype)
            out_ref[b, c_init:, :] = x2.astype(out_ref.dtype)


def _pick_batch_tile(n, per_image_bytes, budget=4 << 20, cap=8):
    """Largest divisor of n (<= cap) whose block fits a modest VMEM budget."""
    nb = min(n, cap)
    while nb > 1 and (n % nb != 0 or nb * per_image_bytes > budget):
        nb -= 1
    return max(nb, 1)


def ghost_module_pallas(x_nchw, w1, s1, b1, wdw, s2, b2, *, out_dtype=jnp.bfloat16):
    """GhostModule forward (ratio=2, k_p=1, k_c=3) with eval-mode BatchNorm folded.

    x_nchw : (N, C1, H, W)
    w1     : (C1, c_init)   1x1 conv weight
    s1, b1 : (c_init,)      BN1 folded scale / bias
    wdw    : (9, c_init)    depthwise 3x3 taps, index = dy*3 + dx
    s2, b2 : (c_init,)      BN2 folded scale / bias
    Returns (N, 2*c_init, H, W) in out_dtype, matching torch.cat([x1, x2], dim=1).
    """
    N, C1, H, W = x_nchw.shape
    HW = H * W
    c_init = w1.shape[1]

    # ---- fold BN1 into the 1x1 weight; bias becomes an extra matmul column ----
    w1_f = (w1 * s1[None, :]).T                                              # (c_init, C1)
    w1_aug = jnp.concatenate([w1_f, b1[:, None]], axis=1).astype(jnp.bfloat16)  # (c_init, C1+1)

    # bf16 activations + appended ones row (bias fold). XLA fuses cast + concat into one pass.
    x_flat = x_nchw.reshape(N, C1, HW).astype(jnp.bfloat16)
    x_aug = jnp.concatenate([x_flat, jnp.ones((N, 1, HW), jnp.bfloat16)], axis=1)  # (N, C1+1, HW)

    # ---- depthwise taps: BN2 scale + SAME-padding masks folded, pre-broadcast along HW ----
    pos = jnp.arange(HW, dtype=jnp.int32)
    col = pos % W
    ones = jnp.ones((HW,), bool)
    col_mask = jnp.stack([col >= 1, ones, col <= W - 2])          # (3, HW): ox = 0,1,2
    row_mask = jnp.stack([pos < HW - W, ones, pos >= W])          # (3, HW): oy = 0,1,2
    mask9 = (row_mask[:, None, :] & col_mask[None, :, :]).reshape(9, HW)
    wdw_b = ((wdw * s2[None, :])[:, :, None]
             * mask9[:, None, :].astype(jnp.float32)).astype(jnp.float32)   # (9, c_init, HW)
    b2_b = jnp.broadcast_to(b2.astype(jnp.float32)[:, None], (c_init, HW))  # (c_init, HW)

    out_itemsize = jnp.dtype(out_dtype).itemsize
    per_image = HW * ((C1 + 1) * 2 + 2 * c_init * out_itemsize + 8 * c_init * 4)
    Nb = _pick_batch_tile(N, per_image)

    cost = pl.CostEstimate(
        flops=int(N * HW * c_init * (2 * (C1 + 1) + 25)),
        transcendentals=0,
        bytes_accessed=int(x_aug.size * 2 + N * 2 * c_init * HW * out_itemsize
                           + w1_aug.size * 2 + wdw_b.size * 4 + b2_b.size * 4),
    )

    kernel = partial(_ghost_kernel, W=W)

    # TODO(synk): for very large feature maps (and for v7x's 2 TCs / 64 MiB VMEM), add a
    # second "parallel" grid axis that row-tiles HW with a 1-row halo and re-budget blocks.
    out = pl.pallas_call(
        kernel,
        out_shape=jax.ShapeDtypeStruct((N, 2 * c_init, HW), out_dtype),
        grid_spec=pltpu.PrefetchScalarGridSpec(
            num_scalar_prefetch=0,
            grid=(N // Nb,),
            in_specs=[
                pl.BlockSpec((Nb, C1 + 1, HW), lambda i: (i, 0, 0)),     # activations (bf16)
                pl.BlockSpec((c_init, C1 + 1), lambda i: (0, 0)),        # 1x1 weight (resident)
                pl.BlockSpec((9, c_init, HW), lambda i: (0, 0, 0)),      # depthwise taps (resident)
                pl.BlockSpec((c_init, HW), lambda i: (0, 0)),            # BN2 bias (resident)
            ],
            out_specs=pl.BlockSpec((Nb, 2 * c_init, HW), lambda i: (i, 0, 0)),  # fused concat
        ),
        compiler_params=pltpu.CompilerParams(
            dimension_semantics=("parallel",),
            vmem_limit_bytes=32 << 20,
        ),
        cost_estimate=cost,
    )(x_aug, w1_aug, wdw_b, b2_b)

    return out.reshape(N, 2 * c_init, H, W)


def ghost_module_reference(x, w1, s1, b1, wdw, s2, b2):
    """Pure-JAX NCHW reference.  The 1x1-conv operands are quantized to bf16 exactly like
    the kernel boundary so the comparison tolerance only has to cover the output cast."""
    c_init = w1.shape[1]
    xq = x.astype(jnp.bfloat16).astype(jnp.float32)
    w1q = (w1 * s1[None, :]).astype(jnp.bfloat16).astype(jnp.float32)
    b1q = b1.astype(jnp.bfloat16).astype(jnp.float32)
    y = jnp.einsum('nchw,co->nohw', xq, w1q) + b1q[None, :, None, None]
    x1 = y * jnp.clip(y + 3.0, 0.0, 6.0) / 6.0
    dw = jnp.transpose(wdw * s2[None, :], (1, 0)).reshape(c_init, 1, 3, 3)   # OIHW, depthwise
    x2 = lax.conv_general_dilated(
        x1, dw, window_strides=(1, 1), padding='SAME',
        feature_group_count=c_init,
        dimension_numbers=('NCHW', 'OIHW', 'NCHW'))
    x2 = x2 + b2[None, :, None, None]
    return jnp.concatenate([x1, x2], axis=1)


if __name__ == "__main__":
    # GhostModule(c1=4, ce=8, ratio=2, k_p=1, k_c=3)
    c1, ce, ratio = 4, 8, 2
    c_init = math.ceil(ce / ratio)
    c_new = c_init * (ratio - 1)
    assert c_new == c_init, "kernel implements the default ratio=2 (pure depthwise cheap op)"
    # TODO(synk): ratio > 2 (extra grouped-conv channel replication) not implemented.

    N, H, W = 2, 16, 16
    eps = 1e-5

    ks = jax.random.split(jax.random.PRNGKey(0), 11)
    x = jax.random.normal(ks[0], (N, c1, H, W), jnp.float32)

    # primary_conv: Conv2d(c1, c_init, 1, bias=False) + BatchNorm2d + Hardswish
    w1 = jax.random.normal(ks[1], (c1, c_init), jnp.float32) * 0.5
    gamma1 = jax.random.uniform(ks[2], (c_init,), jnp.float32, 0.5, 1.5)
    beta1 = jax.random.normal(ks[3], (c_init,), jnp.float32) * 0.1
    mean1 = jax.random.normal(ks[4], (c_init,), jnp.float32) * 0.1
    var1 = jax.random.uniform(ks[5], (c_init,), jnp.float32, 0.5, 1.5)

    # cheap_operation: Conv2d(c_init, c_new, 3, groups=c_init, bias=False) + BatchNorm2d
    wdw = jax.random.normal(ks[6], (9, c_init), jnp.float32) * 0.3   # [dy*3+dx, channel]
    gamma2 = jax.random.uniform(ks[7], (c_init,), jnp.float32, 0.5, 1.5)
    beta2 = jax.random.normal(ks[8], (c_init,), jnp.float32) * 0.1
    mean2 = jax.random.normal(ks[9], (c_init,), jnp.float32) * 0.1
    var2 = jax.random.uniform(ks[10], (c_init,), jnp.float32, 0.5, 1.5)

    # fold BatchNorm (eval mode) into per-channel scale / bias
    s1 = gamma1 / jnp.sqrt(var1 + eps)
    b1 = beta1 - mean1 * s1
    s2 = gamma2 / jnp.sqrt(var2 + eps)
    b2 = beta2 - mean2 * s2

    ghost = jax.jit(ghost_module_pallas)
    out = jax.block_until_ready(ghost(x, w1, s1, b1, wdw, s2, b2))

    ref = ghost_module_reference(x, w1, s1, b1, wdw, s2, b2)
    assert out.shape == (N, 2 * c_init, H, W), out.shape
    assert out.dtype == jnp.bfloat16, out.dtype
    if not jnp.allclose(out.astype(jnp.float32), ref, atol=2e-2, rtol=2e-2):
        err = jnp.max(jnp.abs(out.astype(jnp.float32) - ref))
        raise AssertionError(f"Pallas GhostModule output mismatch (max abs err {err})")
    print("KERNEL_OK")
</pallas_src>

<mosaic_0001>
module attributes {stable_mosaic.version = 11 : i64} {
  func.func @_ghost_kernel(%arg0: i32, %arg1: memref<2x5x256xbf16, #tpu.memory_space<vmem>>, %arg2: memref<4x5xbf16, #tpu.memory_space<vmem>>, %arg3: memref<9x4x256xf32, #tpu.memory_space<vmem>>, %arg4: memref<4x256xf32, #tpu.memory_space<vmem>>, %arg5: memref<2x8x256xbf16, #tpu.memory_space<vmem>>) attributes {dimension_semantics = [#tpu.dimension_semantics<parallel>], iteration_bounds = array<i64: 1>, scalar_prefetch = 0 : i64, scratch_operands = 0 : i64, tpu.core_type = #tpu.core_type<tc>, window_params = [{transform_indices = @transform_0, window_bounds = array<i64: 2, 5, 256>}, {pipeline_mode = #tpu.pipeline_mode<synchronous>, transform_indices = @transform_1, window_bounds = array<i64: 4, 5>}, {pipeline_mode = #tpu.pipeline_mode<synchronous>, transform_indices = @transform_2, window_bounds = array<i64: 9, 4, 256>}, {pipeline_mode = #tpu.pipeline_mode<synchronous>, transform_indices = @transform_3, window_bounds = array<i64: 4, 256>}, {transform_indices = @transform_4, window_bounds = array<i64: 2, 8, 256>}]} {
    %c0 = arith.constant 0 : index
    %c0_0 = arith.constant 0 : index
    %0 = vector.load %arg2[%c0, %c0_0] : memref<4x5xbf16, #tpu.memory_space<vmem>>, vector<4x5xbf16>
    %c0_1 = arith.constant 0 : index
    %c0_2 = arith.constant 0 : index
    %c0_3 = arith.constant 0 : index
    %1 = vector.load %arg3[%c0_1, %c0_2, %c0_3] : memref<9x4x256xf32, #tpu.memory_space<vmem>>, vector<9x4x256xf32>
    %c0_4 = arith.constant 0 : index
    %c0_5 = arith.constant 0 : index
    %2 = vector.load %arg4[%c0_4, %c0_5] : memref<4x256xf32, #tpu.memory_space<vmem>>, vector<4x256xf32>
    %c0_6 = arith.constant 0 : index
    %c0_7 = arith.constant 0 : index
    %c0_8 = arith.constant 0 : index
    %3 = vector.load %arg1[%c0_6, %c0_7, %c0_8] : memref<2x5x256xbf16, #tpu.memory_space<vmem>>, vector<1x5x256xbf16>
    %4 = vector.shape_cast %3 : vector<1x5x256xbf16> to vector<5x256xbf16>
    %cst = arith.constant dense<0.000000e+00> : vector<4x256xf32>
    %5 = tpu.matmul %0, %4, %cst {dimension_numbers = #tpu.dot_dimension_numbers<[1], [0], [0], [1], [0, 0, 1, 1], [], []>} : vector<4x5xbf16>, vector<5x256xbf16>, vector<4x256xf32> -> vector<4x256xf32>
    %cst_9 = arith.constant 3.000000e+00 : f32
    %6 = vector.broadcast %cst_9 : f32 to vector<4x256xf32>
    %7 = arith.addf %5, %6 : vector<4x256xf32>
    %cst_10 = arith.constant 0.000000e+00 : f32
    %cst_11 = arith.constant 6.000000e+00 : f32
    %8 = vector.broadcast %cst_10 : f32 to vector<4x256xf32>
    %9 = arith.maximumf %8, %7 : vector<4x256xf32>
    %10 = vector.broadcast %cst_11 : f32 to vector<4x256xf32>
    %11 = arith.minimumf %10, %9 : vector<4x256xf32>
    %12 = arith.mulf %5, %11 : vector<4x256xf32>
    %cst_12 = arith.constant 0.166666672 : f32
    %13 = vector.broadcast %cst_12 : f32 to vector<4x256xf32>
    %14 = arith.mulf %12, %13 : vector<4x256xf32>
    %c1_i32 = arith.constant 1 : i32
    %15 = tpu.dynamic_rotate %14 by %c1_i32 dim 1 : vector<4x256xf32>, i32 -> vector<4x256xf32>
    %c255_i32 = arith.constant 255 : i32
    %16 = tpu.dynamic_rotate %14 by %c255_i32 dim 1 : vector<4x256xf32>, i32 -> vector<4x256xf32>
    %17 = vector.extract_strided_slice %1 {offsets = [0, 0, 0], sizes = [1, 4, 256], strides = [1, 1, 1]} : vector<9x4x256xf32> to vector<1x4x256xf32>
    %18 = vector.shape_cast %17 : vector<1x4x256xf32> to vector<4x256xf32>
    %19 = arith.mulf %18, %15 : vector<4x256xf32>
    %20 = vector.extract_strided_slice %1 {offsets = [1, 0, 0], sizes = [1, 4, 256], strides = [1, 1, 1]} : vector<9x4x256xf32> to vector<1x4x256xf32>
    %21 = vector.shape_cast %20 : vector<1x4x256xf32> to vector<4x256xf32>
    %22 = arith.mulf %21, %14 : vector<4x256xf32>
    %23 = arith.addf %19, %22 : vector<4x256xf32>
    %24 = vector.extract_strided_slice %1 {offsets = [2, 0, 0], sizes = [1, 4, 256], strides = [1, 1, 1]} : vector<9x4x256xf32> to vector<1x4x256xf32>
    %25 = vector.shape_cast %24 : vector<1x4x256xf32> to vector<4x256xf32>
    %26 = arith.mulf %25, %16 : vector<4x256xf32>
    %27 = arith.addf %23, %26 : vector<4x256xf32>
    %28 = vector.extract_strided_slice %1 {offsets = [3, 0, 0], sizes = [1, 4, 256], strides = [1, 1, 1]} : vector<9x4x256xf32> to vector<1x4x256xf32>
    %29 = vector.shape_cast %28 : vector<1x4x256xf32> to vector<4x256xf32>
    %30 = arith.mulf %29, %15 : vector<4x256xf32>
    %31 = vector.extract_strided_slice %1 {offsets = [4, 0, 0], sizes = [1, 4, 256], strides = [1, 1, 1]} : vector<9x4x256xf32> to vector<1x4x256xf32>
    %32 = vector.shape_cast %31 : vector<1x4x256xf32> to vector<4x256xf32>
    %33 = arith.mulf %32, %14 : vector<4x256xf32>
    %34 = arith.addf %30, %33 : vector<4x256xf32>
    %35 = vector.extract_strided_slice %1 {offsets = [5, 0, 0], sizes = [1, 4, 256], strides = [1, 1, 1]} : vector<9x4x256xf32> to vector<1x4x256xf32>
    %36 = vector.shape_cast %35 : vector<1x4x256xf32> to vector<4x256xf32>
    %37 = arith.mulf %36, %16 : vector<4x256xf32>
    %38 = arith.addf %34, %37 : vector<4x256xf32>
    %39 = vector.extract_strided_slice %1 {offsets = [6, 0, 0], sizes = [1, 4, 256], strides = [1, 1, 1]} : vector<9x4x256xf32> to vector<1x4x256xf32>
    %40 = vector.shape_cast %39 : vector<1x4x256xf32> to vector<4x256xf32>
    %41 = arith.mulf %40, %15 : vector<4x256xf32>
    %42 = vector.extract_strided_slice %1 {offsets = [7, 0, 0], sizes = [1, 4, 256], strides = [1, 1, 1]} : vector<9x4x256xf32> to vector<1x4x256xf32>
    %43 = vector.shape_cast %42 : vector<1x4x256xf32> to vector<4x256xf32>
    %44 = arith.mulf %43, %14 : vector<4x256xf32>
    %45 = arith.addf %41, %44 : vector<4x256xf32>
    %46 = vector.extract_strided_slice %1 {offsets = [8, 0, 0], sizes = [1, 4, 256], strides = [1, 1, 1]} : vector<9x4x256xf32> to vector<1x4x256xf32>
    %47 = vector.shape_cast %46 : vector<1x4x256xf32> to vector<4x256xf32>
    %48 = arith.mulf %47, %16 : vector<4x256xf32>
    %49 = arith.addf %45, %48 : vector<4x256xf32>
    %c16_i32 = arith.constant 16 : i32
    %50 = tpu.dynamic_rotate %27 by %c16_i32 dim 1 : vector<4x256xf32>, i32 -> vector<4x256xf32>
    %51 = arith.addf %38, %50 : vector<4x256xf32>
    %c240_i32 = arith.constant 240 : i32
    %52 = tpu.dynamic_rotate %49 by %c240_i32 dim 1 : vector<4x256xf32>, i32 -> vector<4x256xf32>
    %53 = arith.addf %51, %52 : vector<4x256xf32>
    %54 = arith.addf %53, %2 : vector<4x256xf32>
    %55 = arith.truncf %14 : vector<4x256xf32> to vector<4x256xbf16>
    %c0_13 = arith.constant 0 : index
    %c0_14 = arith.constant 0 : index
    %c0_15 = arith.constant 0 : index
    %56 = vector.load %arg5[%c0_13, %c0_14, %c0_15] : memref<2x8x256xbf16, #tpu.memory_space<vmem>>, vector<1x4x256xbf16>
    %57 = vector.shape_cast %56 : vector<1x4x256xbf16> to vector<4x256xbf16>
    %58 = vector.shape_cast %55 : vector<4x256xbf16> to vector<1x4x256xbf16>
    tpu.vector_store %arg5[%c0_13, %c0_14, %c0_15], %58 {strides = array<i32>} : memref<2x8x256xbf16, #tpu.memory_space<vmem>>, vector<1x4x256xbf16>,
    %59 = arith.truncf %54 : vector<4x256xf32> to vector<4x256xbf16>
    %c0_16 = arith.constant 0 : index
    %c4 = arith.constant 4 : index
    %c0_17 = arith.constant 0 : index
    %60 = vector.load %arg5[%c0_16, %c4, %c0_17] : memref<2x8x256xbf16, #tpu.memory_space<vmem>>, vector<1x4x256xbf16>
    %61 = vector.shape_cast %60 : vector<1x4x256xbf16> to vector<4x256xbf16>
    %62 = vector.shape_cast %59 : vector<4x256xbf16> to vector<1x4x256xbf16>
    tpu.vector_store %arg5[%c0_16, %c4, %c0_17], %62 {strides = array<i32>} : memref<2x8x256xbf16, #tpu.memory_space<vmem>>, vector<1x4x256xbf16>,
    %c1 = arith.constant 1 : index
    %c0_18 = arith.constant 0 : index
    %c0_19 = arith.constant 0 : index
    %63 = vector.load %arg1[%c1, %c0_18, %c0_19] : memref<2x5x256xbf16, #tpu.memory_space<vmem>>, vector<1x5x256xbf16>
    %64 = vector.shape_cast %63 : vector<1x5x256xbf16> to vector<5x256xbf16>
    %cst_20 = arith.constant dense<0.000000e+00> : vector<4x256xf32>
    %65 = tpu.matmul %0, %64, %cst_20 {dimension_numbers = #tpu.dot_dimension_numbers<[1], [0], [0], [1], [0, 0, 1, 1], [], []>} : vector<4x5xbf16>, vector<5x256xbf16>, vector<4x256xf32> -> vector<4x256xf32>
    %cst_21 = arith.constant 3.000000e+00 : f32
    %66 = vector.broadcast %cst_21 : f32 to vector<4x256xf32>
    %67 = arith.addf %65, %66 : vector<4x256xf32>
    %cst_22 = arith.constant 0.000000e+00 : f32
    %cst_23 = arith.constant 6.000000e+00 : f32
    %68 = vector.broadcast %cst_22 : f32 to vector<4x256xf32>
    %69 = arith.maximumf %68, %67 : vector<4x256xf32>
    %70 = vector.broadcast %cst_23 : f32 to vector<4x256xf32>
    %71 = arith.minimumf %70, %69 : vector<4x256xf32>
    %72 = arith.mulf %65, %71 : vector<4x256xf32>
    %cst_24 = arith.constant 0.166666672 : f32
    %73 = vector.broadcast %cst_24 : f32 to vector<4x256xf32>
    %74 = arith.mulf %72, %73 : vector<4x256xf32>
    %c1_i32_25 = arith.constant 1 : i32
    %75 = tpu.dynamic_rotate %74 by %c1_i32_25 dim 1 : vector<4x256xf32>, i32 -> vector<4x256xf32>
    %c255_i32_26 = arith.constant 255 : i32
    %76 = tpu.dynamic_rotate %74 by %c255_i32_26 dim 1 : vector<4x256xf32>, i32 -> vector<4x256xf32>
    %77 = vector.extract_strided_slice %1 {offsets = [0, 0, 0], sizes = [1, 4, 256], strides = [1, 1, 1]} : vector<9x4x256xf32> to vector<1x4x256xf32>
    %78 = vector.shape_cast %77 : vector<1x4x256xf32> to vector<4x256xf32>
    %79 = arith.mulf %78, %75 : vector<4x256xf32>
    %80 = vector.extract_strided_slice %1 {offsets = [1, 0, 0], sizes = [1, 4, 256], strides = [1, 1, 1]} : vector<9x4x256xf32> to vector<1x4x256xf32>
    %81 = vector.shape_cast %80 : vector<1x4x256xf32> to vector<4x256xf32>
    %82 = arith.mulf %81, %74 : vector<4x256xf32>
    %83 = arith.addf %79, %82 : vector<4x256xf32>
    %84 = vector.extract_strided_slice %1 {offsets = [2, 0, 0], sizes = [1, 4, 256], strides = [1, 1, 1]} : vector<9x4x256xf32> to vector<1x4x256xf32>
    %85 = vector.shape_cast %84 : vector<1x4x256xf32> to vector<4x256xf32>
    %86 = arith.mulf %85, %76 : vector<4x256xf32>
    %87 = arith.addf %83, %86 : vector<4x256xf32>
    %88 = vector.extract_strided_slice %1 {offsets = [3, 0, 0], sizes = [1, 4, 256], strides = [1, 1, 1]} : vector<9x4x256xf32> to vector<1x4x256xf32>
    %89 = vector.shape_cast %88 : vector<1x4x256xf32> to vector<4x256xf32>
    %90 = arith.mulf %89, %75 : vector<4x256xf32>
    %91 = vector.extract_strided_slice %1 {offsets = [4, 0, 0], sizes = [1, 4, 256], strides = [1, 1, 1]} : vector<9x4x256xf32> to vector<1x4x256xf32>
    %92 = vector.shape_cast %91 : vector<1x4x256xf32> to vector<4x256xf32>
    %93 = arith.mulf %92, %74 : vector<4x256xf32>
    %94 = arith.addf %90, %93 : vector<4x256xf32>
    %95 = vector.extract_strided_slice %1 {offsets = [5, 0, 0], sizes = [1, 4, 256], strides = [1, 1, 1]} : vector<9x4x256xf32> to vector<1x4x256xf32>
    %96 = vector.shape_cast %95 : vector<1x4x256xf32> to vector<4x256xf32>
    %97 = arith.mulf %96, %76 : vector<4x256xf32>
    %98 = arith.addf %94, %97 : vector<4x256xf32>
    %99 = vector.extract_strided_slice %1 {offsets = [6, 0, 0], sizes = [1, 4, 256], strides = [1, 1, 1]} : vector<9x4x256xf32> to vector<1x4x256xf32>
    %100 = vector.shape_cast %99 : vector<1x4x256xf32> to vector<4x256xf32>
    %101 = arith.mulf %100, %75 : vector<4x256xf32>
    %102 = vector.extract_strided_slice %1 {offsets = [7, 0, 0], sizes = [1, 4, 256], strides = [1, 1, 1]} : vector<9x4x256xf32> to vector<1x4x256xf32>
    %103 = vector.shape_cast %102 : vector<1x4x256xf32> to vector<4x256xf32>
    %104 = arith.mulf %103, %74 : vector<4x256xf32>
    %105 = arith.addf %101, %104 : vector<4x256xf32>
    %106 = vector.extract_strided_slice %1 {offsets = [8, 0, 0], sizes = [1, 4, 256], strides = [1, 1, 1]} : vector<9x4x256xf32> to vector<1x4x256xf32>
    %107 = vector.shape_cast %106 : vector<1x4x256xf32> to vector<4x256xf32>
    %108 = arith.mulf %107, %76 : vector<4x256xf32>
    %109 = arith.addf %105, %108 : vector<4x256xf32>
    %c16_i32_27 = arith.constant 16 : i32
    %110 = tpu.dynamic_rotate %87 by %c16_i32_27 dim 1 : vector<4x256xf32>, i32 -> vector<4x256xf32>
    %111 = arith.addf %98, %110 : vector<4x256xf32>
    %c240_i32_28 = arith.constant 240 : i32
    %112 = tpu.dynamic_rotate %109 by %c240_i32_28 dim 1 : vector<4x256xf32>, i32 -> vector<4x256xf32>
    %113 = arith.addf %111, %112 : vector<4x256xf32>
    %114 = arith.addf %113, %2 : vector<4x256xf32>
    %115 = arith.truncf %74 : vector<4x256xf32> to vector<4x256xbf16>
    %c1_29 = arith.constant 1 : index
    %c0_30 = arith.constant 0 : index
    %c0_31 = arith.constant 0 : index
    %116 = vector.load %arg5[%c1_29, %c0_30, %c0_31] : memref<2x8x256xbf16, #tpu.memory_space<vmem>>, vector<1x4x256xbf16>
    %117 = vector.shape_cast %116 : vector<1x4x256xbf16> to vector<4x256xbf16>
    %118 = vector.shape_cast %115 : vector<4x256xbf16> to vector<1x4x256xbf16>
    tpu.vector_store %arg5[%c1_29, %c0_30, %c0_31], %118 {strides = array<i32>} : memref<2x8x256xbf16, #tpu.memory_space<vmem>>, vector<1x4x256xbf16>,
    %119 = arith.truncf %114 : vector<4x256xf32> to vector<4x256xbf16>
    %c1_32 = arith.constant 1 : index
    %c4_33 = arith.constant 4 : index
    %c0_34 = arith.constant 0 : index
    %120 = vector.load %arg5[%c1_32, %c4_33, %c0_34] : memref<2x8x256xbf16, #tpu.memory_space<vmem>>, vector<1x4x256xbf16>
    %121 = vector.shape_cast %120 : vector<1x4x256xbf16> to vector<4x256xbf16>
    %122 = vector.shape_cast %119 : vector<4x256xbf16> to vector<1x4x256xbf16>
    tpu.vector_store %arg5[%c1_32, %c4_33, %c0_34], %122 {strides = array<i32>} : memref<2x8x256xbf16, #tpu.memory_space<vmem>>, vector<1x4x256xbf16>,
    return
  }
  func.func @transform_0(%arg0: i32) -> (i32, i32, i32) {
    %c0_i32 = arith.constant 0 : i32
    %c0_i32_0 = arith.constant 0 : i32
    %c0_i32_1 = arith.constant 0 : i32
    return %arg0, %c0_i32, %c0_i32_0 : i32, i32, i32
  }
  func.func @transform_1(%arg0: i32) -> (i32, i32) {
    %c0_i32 = arith.constant 0 : i32
    %c0_i32_0 = arith.constant 0 : i32
    %c0_i32_1 = arith.constant 0 : i32
    return %c0_i32, %c0_i32_0 : i32, i32
  }
  func.func @transform_2(%arg0: i32) -> (i32, i32, i32) {
    %c0_i32 = arith.constant 0 : i32
    %c0_i32_0 = arith.constant 0 : i32
    %c0_i32_1 = arith.constant 0 : i32
    %c0_i32_2 = arith.constant 0 : i32
    return %c0_i32, %c0_i32_0, %c0_i32_1 : i32, i32, i32
  }
  func.func @transform_3(%arg0: i32) -> (i32, i32) {
    %c0_i32 = arith.constant 0 : i32
    %c0_i32_0 = arith.constant 0 : i32
    %c0_i32_1 = arith.constant 0 : i32
    return %c0_i32, %c0_i32_0 : i32, i32
  }
  func.func @transform_4(%arg0: i32) -> (i32, i32, i32) {
    %c0_i32 = arith.constant 0 : i32
    %c0_i32_0 = arith.constant 0 : i32
    %c0_i32_1 = arith.constant 0 : i32
    return %arg0, %c0_i32, %c0_i32_0 : i32, i32, i32
  }
}

</mosaic_0001>

<bundles_post_ra>
// kernel: ghost_module_pallas.1
= control target key start
LH: loop header
LB: loop body
LE: loop exit
PB: predicated region body
PF: predicated region fallthrough
CT: control target
= control target key end

     0   :  { %vm39_vm0 = vcmask 1041408   ;;  %vm40_vm1 = vcmask 1042432   ;;  %v382_v1 = vmov 65535   ;;  %v383_v4 = vmov 0   ;;  %s385_s24 = smov 127   ;;  %s386_s17 = smov 16   ;;  %s491_s0 = inlined_call_operand.vmem [shape: bf16[2,5,256], index: 0, kind: input, shape index: {}]   ;;  %s492_s1 = inlined_call_operand.vmem [shape: bf16[4,5], index: 1, kind: input, shape index: {}]   ;;  %s493_s4 = inlined_call_operand.vmem [shape: bf16[2,8,256], index: 4, kind: output, shape index: {}]   ;;  %s494_s2 = inlined_call_operand.vmem [shape: f32[9,4,256], index: 2, kind: input, shape index: {}]   ;;  %s495_s3 = inlined_call_operand.vmem [shape: f32[4,256], index: 3, kind: input, shape index: {}]  }
   0x1   :  { %v29_v0 = vld [vmem:[%s491_s0] sm:$0x77]  ;;  %v41_v2 = vsel %vm39_vm0, 4294967295, %v382_v1  ;;  %v360_v3 = vld [vmem:[%s491_s0 + $0x8] sm:$0x77]  ;;  %81 = vmatprep.mubr.bf16.mxu0 %v383_v4  ;;  %241 = vmatprep.mubr.bf16.mxu1 %v383_v4  ;;  %vm35_vm2 = vcmask 39936   ;;  %v104_v47 = vlaneseq }
   0x2   :  { %v356_v5 = vcombine.high %v29_v0, %v29_v0  ;;  %v42_v6 = vsel %vm40_vm1, %v41_v2, 0  ;;  %v362_v7 = vcombine.high %v360_v3, %v360_v3  ;;  %v355_v8 = vcombine.low %v29_v0, %v29_v0  ;;  %v18_v14 = vld [vmem:[%s492_s1] sm:$0x3]  ;;  %s384_s0 = smov 1   ;;  %v22_v53 = vld [vmem:[%s494_s2 + $0x18] sm:$0xff]  ;;  %v20_v61 = vld [vmem:[%s494_s2 + $0x8] sm:$0xff] }
   0x3   :  { %v361_v9 = vcombine.low %v360_v3, %v360_v3  ;;  %v430_v48 = vand.u32 127, %v104_v47  ;;  %v23_v56 = vld [vmem:[%s494_s2 + $0x20] sm:$0xff]  ;;  %s387_s18 = smov 112  }
   0x4   :  { %v47_v10 = vand.u32 %v356_v5, %v42_v6  ;;  %v207_v11 = vand.u32 %v362_v7, %v42_v6  ;;  %v44_v12 = vand.u32 %v355_v8, %v42_v6  ;;  %v19_v63 = vld [vmem:[%s494_s2] sm:$0xff] }
   0x5   :  { %v204_v13 = vand.u32 %v361_v9, %v42_v6  ;;  %vm106_vm3 = vcmp.lt.s32.totalorder %v430_v48, 1  ;;  %vm113_vm4 = vcmp.lt.s32.totalorder %v430_v48, 127  ;;  %v21_v6 = vld [vmem:[%s494_s2 + $0x10] sm:$0xff]  ;;  %vm150_vm5 = vcmp.lt.s32.totalorder %v430_v48, 16 }
   0x6   :  { %63 = vmatprep.subr.bf16.mxu0 %v47_v10  ;;  %223 = vmatprep.subr.bf16.mxu1 %v207_v11  ;;  %v25_v9 = vld [vmem:[%s494_s2 + $0x30] sm:$0xff]  ;;  %v24_v11 = vld [vmem:[%s494_s2 + $0x28] sm:$0xff]  ;;  %vm165_vm6 = vcmp.lt.s32.totalorder %v430_v48, 112 }
   0x7   :  { %64 = vmatpush1.bf16.msra.mxu0 %v44_v12  ;;  %224 = vmatpush1.bf16.msra.mxu1 %v204_v13 }
   0xa   :  { %357 = vmatmul.mubr.msk.bf16.vlgmr.msra.gmra.mxu0 %vm35_vm2, %v18_v14  ;;  %363 = vmatmul.mubr.msk.bf16.vlgmr.msra.gmra.mxu1 %vm35_vm2, %v18_v14 }
  0xca   :  { %v83_v15 = vpop.f32.mrf.mxu0  ;;  %v243_v16 = vpop.f32.mrf.mxu1 }
  0xcb   :  { %v90_v17 = vadd.f32 3.0, %v83_v15  ;;  %v250_v18 = vadd.f32 3.0, %v243_v16 }
  0xcc   :  { %v85_v19 = vpop.f32.mrf.mxu0  ;;  %v245_v20 = vpop.f32.mrf.mxu1 }
  0xcd   :  { %v92_v21 = vmax.f32 %v90_v17, 0.0  ;;  %v252_v22 = vmax.f32 %v250_v18, 0.0  ;;  %v91_v23 = vadd.f32 3.0, %v85_v19  ;;  %v251_v24 = vadd.f32 3.0, %v245_v20 }
  0xce   :  { %v87_v25 = vpop.f32.mrf.mxu0  ;;  %v247_v26 = vpop.f32.mrf.mxu1 }
  0xcf   :  { %v94_v27 = vmin.f32 %v92_v21, 6.0  ;;  %v254_v28 = vmin.f32 %v252_v22, 6.0  ;;  %v93_v29 = vmax.f32 %v91_v23, 0.0  ;;  %v253_v30 = vmax.f32 %v251_v24, 0.0 }
  0xd0   :  { %v88_v31 = vpop.f32.mrf.mxu0  ;;  %v248_v32 = vpop.f32.mrf.mxu1 }
  0xd1   :  { %v96_v33 = vmul.f32 %v94_v27, %v83_v15  ;;  %v256_v34 = vmul.f32 %v254_v28, %v243_v16  ;;  %v95_v35 = vmin.f32 %v93_v29, 6.0  ;;  %v255_v36 = vmin.f32 %v253_v30, 6.0  ;;  %v26_v16 = vld [vmem:[%s494_s2 + $0x38] sm:$0xff]  ;;  %v27_v32 = vld [vmem:[%s494_s2 + $0x40] sm:$0xff] }
  0xd3   :  { %v98_v37 = vmul.f32 0.16666667, %v96_v33  ;;  %v258_v38 = vmul.f32 0.16666667, %v256_v34  ;;  %v97_v39 = vmul.f32 %v95_v35, %v85_v19  ;;  %v257_v40 = vmul.f32 %v255_v36, %v245_v20 }
  0xd5   :  { %v99_v41 = vmul.f32 0.16666667, %v97_v39  ;;  %v259_v42 = vmul.f32 0.16666667, %v257_v40  ;;  %260 = vrot.lane.b32.xlu1 %v258_v38, %s384_s0  ;;  %100 = vrot.lane.b32.xlu0 %v98_v37, %s384_s0 }
  0xd7   :  { %v123_v43 = vcombine.low %v98_v37, %v99_v41  ;;  %v368_v44 = vpack.c.bf16 %v99_v41, %v98_v37  ;;  %v422_v45 = vcombine.low %v258_v38, %v259_v42  ;;  %v370_v46 = vpack.c.bf16 %v259_v42, %v258_v38 }
  0xd9   :  { %182 = vst [vmem:[%s493_s4] sm:$0x33] %v368_v44  ;;  %365 = vst [vmem:[%s493_s4 + $0x8] sm:$0x33] %v370_v46  ;;  %262 = vrot.lane.b32.xlu1 %v259_v42, %s384_s0  ;;  %109 = vrot.lane.b32.xlu0 %v98_v37, %s385_s24  ;;  %v290_v62 = vmul.f32 %v422_v45, %v23_v56  ;;  %v125_v7 = vmul.f32 %v123_v43, %v20_v61 }
  0xda   :  { %v134_v17 = vmul.f32 %v123_v43, %v23_v56  ;;  %v281_v21 = vmul.f32 %v422_v45, %v20_v61  ;;  %v139_v27 = vmul.f32 %v123_v43, %v26_v16 }
  0xdd   :  { %111 = vrot.lane.b32.xlu1 %v99_v41, %s385_s24  ;;  %102 = vrot.lane.b32.xlu0 %v99_v41, %s384_s0 }
  0xe1   :  { %268 = vrot.lane.b32.xlu1 %v259_v42, %s385_s24  ;;  %266 = vrot.lane.b32.xlu0 %v258_v38, %s385_s24  ;;  %v295_v42 = vmul.f32 %v422_v45, %v26_v16 }
 0x147   :  { %v261_v49 = vpop.permute.xlu1 %260  ;;  %v101_v50 = vpop.permute.xlu0 %100 }
 0x14b   :  { %v263_v51 = vpop.permute.xlu1 %262  ;;  %v110_v52 = vpop.permute.xlu0 %109 }
 0x14c   :  { %v264_v54 = vsel %vm106_vm3, %v261_v49, %v263_v51  ;;  %v265_v55 = vsel %vm106_vm3, %v263_v51, %v261_v49 }
 0x14d   :  { %v274_v57 = vcombine.low %v265_v55, %v264_v54 }
 0x14f   :  { %v289_v58 = vmul.f32 %v274_v57, %v22_v53  ;;  %v112_v59 = vpop.permute.xlu1 %111  ;;  %v103_v60 = vpop.permute.xlu0 %102  ;;  %v276_v10 = vmul.f32 %v274_v57, %v19_v63  ;;  %v294_v38 = vmul.f32 %v274_v57, %v25_v9 }
 0x150   :  { %v114_v0 = vsel %vm113_vm4, %v110_v52, %v112_v59  ;;  %v115_v1 = vsel %vm113_vm4, %v112_v59, %v110_v52  ;;  %v107_v2 = vsel %vm106_vm3, %v101_v50, %v103_v60  ;;  %v108_v3 = vsel %vm106_vm3, %v103_v60, %v101_v50 }
 0x151   :  { %v129_v4 = vcombine.low %v114_v0, %v115_v1  ;;  %v118_v5 = vcombine.low %v108_v3, %v107_v2  ;;  %v291_v8 = vadd.f32 %v290_v62, %v289_v58  ;;  %v282_v30 = vadd.f32 %v281_v21, %v276_v10  ;;  %v28_v1 = vld [vmem:[%s495_s3] sm:$0xff] }
 0x152   :  { %v296_v44 = vadd.f32 %v295_v42, %v294_v38 }
 0x153   :  { %v120_v12 = vmul.f32 %v118_v5, %v19_v63  ;;  %v133_v13 = vmul.f32 %v118_v5, %v22_v53  ;;  %v269_v14 = vpop.permute.xlu1 %268  ;;  %v267_v15 = vpop.permute.xlu0 %266  ;;  %v138_v18 = vmul.f32 %v118_v5, %v25_v9  ;;  %v131_v24 = vmul.f32 %v129_v4, %v21_v6 }
 0x154   :  { %v270_v19 = vsel %vm113_vm4, %v267_v15, %v269_v14  ;;  %v271_v20 = vsel %vm113_vm4, %v269_v14, %v267_v15  ;;  %v136_v26 = vmul.f32 %v129_v4, %v24_v11  ;;  %v141_v39 = vmul.f32 %v129_v4, %v27_v32 }
 0x155   :  { %v285_v22 = vcombine.low %v270_v19, %v271_v20  ;;  %v126_v23 = vadd.f32 %v125_v7, %v120_v12  ;;  %v135_v25 = vadd.f32 %v134_v17, %v133_v13  ;;  %v140_v36 = vadd.f32 %v139_v27, %v138_v18 }
 0x157   :  { %v292_v28 = vmul.f32 %v285_v22, %v24_v11  ;;  %v132_v29 = vadd.f32 %v131_v24, %v126_v23  ;;  %v287_v31 = vmul.f32 %v285_v22, %v21_v6  ;;  %v137_v33 = vadd.f32 %v136_v26, %v135_v25 }
 0x158   :  { %v142_v41 = vadd.f32 %v141_v39, %v140_v36  ;;  %v297_v43 = vmul.f32 %v285_v22, %v27_v32 }
 0x159   :  { %146 = vrot.lane.b32.xlu0 %v132_v29, %s386_s17  ;;  %v144_v34 = vcombine.high %v132_v29, %v132_v29  ;;  %v288_v35 = vadd.f32 %v287_v31, %v282_v30  ;;  %v293_v37 = vadd.f32 %v292_v28, %v291_v8 }
 0x15a   :  { %v159_v46 = vcombine.high %v142_v41, %v142_v41  ;;  %v298_v47 = vadd.f32 %v297_v43, %v296_v44 }
 0x15b   :  { %148 = vrot.lane.b32.xlu1 %v144_v34, %s386_s17  ;;  %v300_v40 = vcombine.high %v288_v35, %v288_v35 }
 0x15c   :  { %v314_v49 = vcombine.high %v298_v47, %v298_v47 }
 0x15d   :  { %302 = vrot.lane.b32.xlu0 %v288_v35, %s386_s17 }
 0x15f   :  { %304 = vrot.lane.b32.xlu1 %v300_v40, %s386_s17 }
 0x161   :  { %161 = vrot.lane.b32.xlu0 %v142_v41, %s387_s18 }
 0x163   :  { %163 = vrot.lane.b32.xlu1 %v159_v46, %s387_s18 }
 0x165   :  { %316 = vrot.lane.b32.xlu0 %v298_v47, %s387_s18 }
 0x167   :  { %318 = vrot.lane.b32.xlu1 %v314_v49, %s387_s18 }
 0x1cb   :  { %v147_v50 = vpop.permute.xlu0 %146 }
 0x1cd   :  { %v149_v51 = vpop.permute.xlu1 %148 }
 0x1ce   :  { %v151_v53 = vsel %vm150_vm5, %v147_v50, %v149_v51  ;;  %v152_v54 = vsel %vm150_vm5, %v149_v51, %v147_v50 }
 0x1cf   :  { %v303_v52 = vpop.permute.xlu0 %302  ;;  %v155_v45 = vcombine.low %v152_v54, %v151_v53 }
 0x1d1   :  { %v305_v55 = vpop.permute.xlu1 %304  ;;  %v157_v62 = vadd.f32 %v155_v45, %v137_v33 }
 0x1d2   :  { %v306_v57 = vsel %vm150_vm5, %v303_v52, %v305_v55  ;;  %v307_v58 = vsel %vm150_vm5, %v305_v55, %v303_v52 }
 0x1d3   :  { %v162_v56 = vpop.permute.xlu0 %161  ;;  %v310_v63 = vcombine.low %v307_v58, %v306_v57 }
 0x1d5   :  { %v164_v59 = vpop.permute.xlu1 %163  ;;  %v312_v7 = vadd.f32 %v310_v63, %v293_v37 }
 0x1d6   :  { %v166_v60 = vsel %vm165_vm6, %v162_v56, %v164_v59  ;;  %v167_v61 = vsel %vm165_vm6, %v164_v59, %v162_v56 }
 0x1d7   :  { %v170_v0 = vcombine.low %v166_v60, %v167_v61  ;;  %v317_v3 = vpop.permute.xlu0 %316 }
 0x1d9   :  { %v172_v2 = vadd.f32 %v170_v0, %v157_v62  ;;  %v319_v4 = vpop.permute.xlu1 %318 }
 0x1da   :  { %v320_v5 = vsel %vm165_vm6, %v317_v3, %v319_v4  ;;  %v321_v6 = vsel %vm165_vm6, %v319_v4, %v317_v3 }
 0x1db   :  { %v173_v8 = vadd.f32 %v172_v2, %v28_v1  ;;  %v324_v48 = vcombine.low %v320_v5, %v321_v6 }
 0x1dd   :  { %v184_v9 = vcombine.high %v173_v8, %v173_v8  ;;  %v326_v10 = vadd.f32 %v324_v48, %v312_v7 }
 0x1df   :  { %v369_v11 = vpack.c.bf16 %v184_v9, %v173_v8  ;;  %v327_v12 = vadd.f32 %v326_v10, %v28_v1 }
 0x1e1   :  { %v193_v13 = vrot.slane %v369_v11, 6  ;;  %v339_v14 = vcombine.high %v327_v12, %v327_v12 }
 0x1e3   :  { %195 = vst [vmem:[%s493_s4] sm:$0xcc] %v193_v13  ;;  %v371_v15 = vpack.c.bf16 %v339_v14, %v327_v12 }
 0x1e5   :  { %v348_v16 = vrot.slane %v371_v15, 6 }
 0x1e7   :  { %367 = vst [vmem:[%s493_s4 + $0x8] sm:$0xcc] %v348_v16 }

</bundles_post_ra>
